<compile_context>
chip_gen: v7x
topology: tpu7x:2x2x1
jax: 0.10.0
libtpu: 0.0.40
codegen_flags: <defaults>
</compile_context>

<pallas_src>
import functools

import jax
import jax.numpy as jnp
from jax.experimental import pallas as pl
from jax.experimental.pallas import tpu as pltpu

LANE = 128      # vreg lane width
SUBLANE = 8     # vreg sublane height


def _round_up(n, m):
    return ((n + m - 1) // m) * m


# ----------------------------------------------------------------------------
# Pallas kernel: fused (collapsed) affine map over one batch tile
# ----------------------------------------------------------------------------
def affine_kernel(x_ref, w_ref, b_ref, o_ref):
    x = x_ref[...]                                   # (tb, a)
    w = w_ref[...]                                   # (a, d)  resident in VMEM
    b = b_ref[...]                                   # (1, d)  f32

    if x_ref.shape[1] == 1:
        # K == 1 contraction is an outer product: VPU broadcast-multiply,
        # no (mostly dead) MXU pass.
        y = x * w + b                                # (tb,1)*(1,d) + (1,d)
    else:
        y = jnp.dot(x, w, preferred_element_type=jnp.float32) + b

    o_ref[...] = y.astype(o_ref.dtype)               # true-width store (tb, d)


# ----------------------------------------------------------------------------
# One-time parameter collapse (exact: no activations between the Linears)
# ----------------------------------------------------------------------------
def prepare_fused_params(params):
    """Collapse Linear(a,b) -> Linear(b,c) -> Linear(c,d) into one affine map.

    Returns (w_eff, b_eff) with w_eff: (a, d), b_eff: (1, d), both float32.
    Mathematically exact vs the sequential forward (up to f32 rounding).
    """
    w1, b1, w2, b2, w3, b3 = params
    w_eff = (w1 @ w2) @ w3                           # (a, d)
    b_eff = (b1 @ w2 + b2) @ w3 + b3                 # (1, d)
    return w_eff.astype(jnp.float32), b_eff.astype(jnp.float32)


# ----------------------------------------------------------------------------
# Wrapper: batch-gridded, weight-stationary pallas_call
# ----------------------------------------------------------------------------
@functools.partial(jax.jit, static_argnames=("compute_dtype", "tb_max"))
def net_forward(x, w_eff, b_eff, *, compute_dtype=jnp.float32, tb_max=2048):
    """Net.forward(x).

    x:      (B, a) float32
    w_eff:  (a, d) collapsed weight (from prepare_fused_params)
    b_eff:  (1, d) collapsed bias   (kept f32)
    returns (B, d) in x.dtype
    """
    B, a = x.shape
    d = w_eff.shape[1]

    # --- batch tiling -------------------------------------------------------
    # tb_max forced to a sublane multiple (review correctness concern), tiles
    # large to amortize per-step overhead, and >= 2 (ideally 4) grid steps are
    # guaranteed when there is enough work so the "parallel" axis can be
    # sharded across v7x's two TensorCores.
    tb_max = max(SUBLANE, (tb_max // SUBLANE) * SUBLANE)
    b8 = _round_up(max(B, 1), SUBLANE)
    if b8 >= 4 * SUBLANE:
        min_grid = 4
    elif b8 >= 2 * SUBLANE:
        min_grid = 2
    else:
        min_grid = 1
    grid_n = max(pl.cdiv(b8, tb_max), min_grid)
    tb = min(_round_up(pl.cdiv(b8, grid_n), SUBLANE), tb_max)
    grid_n = pl.cdiv(b8, tb)
    b_pad = grid_n * tb                              # overshoots B by < tb

    # --- operands ------------------------------------------------------------
    xc = x.astype(compute_dtype)
    if b_pad != B:                                   # pad only when needed
        xc = jnp.zeros((b_pad, a), compute_dtype).at[:B, :].set(xc)
    wc = w_eff.astype(compute_dtype)                 # bias stays f32

    out = pl.pallas_call(
        affine_kernel,
        out_shape=jax.ShapeDtypeStruct((b_pad, d), x.dtype),
        grid=(grid_n,),
        in_specs=[
            pl.BlockSpec((tb, a), lambda i: (i, 0)),   # batch-streamed x
            pl.BlockSpec((a, d), lambda i: (0, 0)),    # weight-stationary
            pl.BlockSpec((1, d), lambda i: (0, 0)),    # bias-stationary
        ],
        out_specs=pl.BlockSpec((tb, d), lambda i: (i, 0)),  # true-width output
        compiler_params=pltpu.CompilerParams(
            dimension_semantics=("parallel",),
        ),
    )(xc, wc, b_eff)

    return out if b_pad == B else out[:B, :]


# ----------------------------------------------------------------------------
# Deterministic parameter init (mirrors torch.nn.Linear default:
# U(-1/sqrt(fan_in), +1/sqrt(fan_in)) for both weight and bias).
# ----------------------------------------------------------------------------
def init_linear(key, fan_in, fan_out):
    kw, kb = jax.random.split(key)
    bound = 1.0 / jnp.sqrt(jnp.float32(fan_in))
    w = jax.random.uniform(kw, (fan_in, fan_out), jnp.float32, -bound, bound)
    b = jax.random.uniform(kb, (1, fan_out), jnp.float32, -bound, bound)
    return w, b


def init_net_params(key, a, b, c, d):
    k1, k2, k3 = jax.random.split(key, 3)
    w1, b1 = init_linear(k1, a, b)
    w2, b2 = init_linear(k2, b, c)
    w3, b3 = init_linear(k3, c, d)
    return (w1, b1, w2, b2, w3, b3)


def net_forward_ref(x, params):
    """Pure-JAX reference: same math/structure as the PyTorch Sequential."""
    w1, b1, w2, b2, w3, b3 = params
    h = x @ w1 + b1
    h = h @ w2 + b2
    return h @ w3 + b3


if __name__ == "__main__":
    # Shapes implied by the original script: x = np.array([0, 20]).reshape(2, 1)
    # -> batch=2, a=1.  Hidden / output dims small: b=32, c=16, d=8.
    A, B_, C, D = 1, 32, 16, 8
    batch = 2

    key = jax.random.PRNGKey(0)
    params = init_net_params(key, A, B_, C, D)
    w_eff, b_eff = prepare_fused_params(params)

    # Deterministic input matching the PyTorch script's x = [[0], [20]].
    x = jnp.array([[0.0], [20.0]], dtype=jnp.float32)    # (2, 1)

    y = jax.block_until_ready(net_forward(x, w_eff, b_eff))
    y_ref = net_forward_ref(x, params)
    assert y.shape == (batch, D), f"bad output shape {y.shape}"
    # Collapsed affine map differs from the sequential reference only by f32
    # reassociation rounding (values ~O(10)), so a few-1e-4 tolerance is apt.
    assert jnp.allclose(y, y_ref, atol=2e-3, rtol=2e-3), "mismatch vs reference"

    # Exercise the multi-step (grid >= 4) batch path, tile-aligned -> no
    # padding and no post-slice copy.
    xb = jax.random.normal(jax.random.PRNGKey(1), (64, A), jnp.float32)
    yb = jax.block_until_ready(net_forward(xb, w_eff, b_eff))
    yb_ref = net_forward_ref(xb, params)
    assert yb.shape == (64, D)
    assert jnp.allclose(yb, yb_ref, atol=2e-3, rtol=2e-3), "grid-path mismatch"

    # Ragged batch (B not a sublane multiple) exercises the pad+slice path.
    xr = jax.random.normal(jax.random.PRNGKey(2), (13, A), jnp.float32)
    yr = jax.block_until_ready(net_forward(xr, w_eff, b_eff))
    yr_ref = net_forward_ref(xr, params)
    assert yr.shape == (13, D)
    assert jnp.allclose(yr, yr_ref, atol=2e-3, rtol=2e-3), "ragged-path mismatch"

    print("KERNEL_OK")
</pallas_src>

<mosaic_0001>
module attributes {stable_mosaic.version = 11 : i64} {
  func.func @affine_kernel(%arg0: i32, %arg1: memref<8x1xf32, #tpu.memory_space<vmem>>, %arg2: memref<1x8xf32, #tpu.memory_space<vmem>>, %arg3: memref<1x8xf32, #tpu.memory_space<vmem>>, %arg4: memref<8x8xf32, #tpu.memory_space<vmem>>) attributes {dimension_semantics = [#tpu.dimension_semantics<parallel>], iteration_bounds = array<i64: 1>, scalar_prefetch = 0 : i64, scratch_operands = 0 : i64, tpu.core_type = #tpu.core_type<tc>, window_params = [{transform_indices = @transform_0, window_bounds = array<i64: 8, 1>}, {pipeline_mode = #tpu.pipeline_mode<synchronous>, transform_indices = @transform_1, window_bounds = array<i64: 1, 8>}, {pipeline_mode = #tpu.pipeline_mode<synchronous>, transform_indices = @transform_2, window_bounds = array<i64: 1, 8>}, {transform_indices = @transform_3, window_bounds = array<i64: 8, 8>}]} {
    %c0 = arith.constant 0 : index
    %c0_0 = arith.constant 0 : index
    %0 = vector.load %arg1[%c0, %c0_0] : memref<8x1xf32, #tpu.memory_space<vmem>>, vector<8x1xf32>
    %c0_1 = arith.constant 0 : index
    %c0_2 = arith.constant 0 : index
    %1 = vector.load %arg2[%c0_1, %c0_2] : memref<1x8xf32, #tpu.memory_space<vmem>>, vector<1x8xf32>
    %c0_3 = arith.constant 0 : index
    %c0_4 = arith.constant 0 : index
    %2 = vector.load %arg3[%c0_3, %c0_4] : memref<1x8xf32, #tpu.memory_space<vmem>>, vector<1x8xf32>
    %3 = vector.broadcast %0 : vector<8x1xf32> to vector<8x8xf32>
    %4 = vector.broadcast %1 : vector<1x8xf32> to vector<8x8xf32>
    %5 = arith.mulf %3, %4 : vector<8x8xf32>
    %6 = vector.broadcast %2 : vector<1x8xf32> to vector<8x8xf32>
    %7 = arith.addf %5, %6 : vector<8x8xf32>
    %c0_5 = arith.constant 0 : index
    %c0_6 = arith.constant 0 : index
    %8 = vector.load %arg4[%c0_5, %c0_6] : memref<8x8xf32, #tpu.memory_space<vmem>>, vector<8x8xf32>
    tpu.vector_store %arg4[%c0_5, %c0_6], %7 {strides = array<i32>} : memref<8x8xf32, #tpu.memory_space<vmem>>, vector<8x8xf32>,
    return
  }
  func.func @transform_0(%arg0: i32) -> (i32, i32) {
    %c0_i32 = arith.constant 0 : i32
    %c0_i32_0 = arith.constant 0 : i32
    return %arg0, %c0_i32 : i32, i32
  }
  func.func @transform_1(%arg0: i32) -> (i32, i32) {
    %c0_i32 = arith.constant 0 : i32
    %c0_i32_0 = arith.constant 0 : i32
    %c0_i32_1 = arith.constant 0 : i32
    return %c0_i32, %c0_i32_0 : i32, i32
  }
  func.func @transform_2(%arg0: i32) -> (i32, i32) {
    %c0_i32 = arith.constant 0 : i32
    %c0_i32_0 = arith.constant 0 : i32
    %c0_i32_1 = arith.constant 0 : i32
    return %c0_i32, %c0_i32_0 : i32, i32
  }
  func.func @transform_3(%arg0: i32) -> (i32, i32) {
    %c0_i32 = arith.constant 0 : i32
    %c0_i32_0 = arith.constant 0 : i32
    return %arg0, %c0_i32 : i32, i32
  }
}

</mosaic_0001>

<bundles_post_ra>
// kernel: net_forward.1
= control target key start
LH: loop header
LB: loop body
LE: loop exit
PB: predicated region body
PF: predicated region fallthrough
CT: control target
= control target key end

     0   :  { %v46_v0 = vmov 0   ;;  %vm36_vm0 = vcmask 64512   ;;  %s79_s0 = inlined_call_operand.vmem [shape: f32[8,1], index: 0, kind: input, shape index: {}]   ;;  %s80_s1 = inlined_call_operand.vmem [shape: f32[1,8], index: 1, kind: input, shape index: {}]   ;;  %s81_s2 = inlined_call_operand.vmem [shape: f32[1,8], index: 2, kind: input, shape index: {}]   ;;  %s82_s3 = inlined_call_operand.vmem [shape: f32[8,8], index: 3, kind: output, shape index: {}]  }
   0x1   :  { %45 = vset.pattern.permute.xlu0 %v46_v0  ;;  %v14_v1 = vld [vmem:[%s79_s0] sm:$0xff] }
   0x2   :  { %19 = vperm.xlu0 %45, %v14_v1   ;;  %v42_v2 = vld [vmem:[%s80_s1] ss:$0 sm:$0xff] }
   0x3   :  { %v43_v3 = vld [vmem:[%s81_s2] ss:$0 sm:$0xff] }
  0x81   :  { %v20_v4 = vpop.permute.xlu0 %19 }
  0x82   :  { %v28_v5 = vmul.f32 %v42_v2, %v20_v4 }
  0x84   :  { %v35_v6 = vadd.f32 %v43_v3, %v28_v5 }
  0x86   :  { %37 = vst.msk [vmem:[%s82_s3] sm:$0xff] %vm36_vm0, %v35_v6 }

</bundles_post_ra>
